<compile_context>
chip_gen: v5e
topology: v5e:2x2
jax: 0.10.0
libtpu: 0.0.40
codegen_flags: <defaults>
</compile_context>

<pallas_src>
import functools

import jax
import jax.numpy as jnp
from jax.experimental import pallas as pl
from jax.experimental.pallas import tpu as pltpu


def _round_up(x, m):
    return (x + m - 1) // m * m


def regression2_kernel(x_ref, w1_ref, b1_ref, w2_ref, b2_ref, o_ref):
    # x_ref:  (TILE_B, D)  f32 or bf16 (streamed per grid step)
    # w1_ref: (D, H)       same dtype as x_ref (VMEM-resident)
    # b1_ref: (1, H)       f32 (VMEM-resident)
    # w2_ref: (1, H)       f32 (VMEM-resident)
    # b2_ref: (1, 1)       f32 scalar in SMEM
    # o_ref:  (1, TILE_B)  f32 lane-dense output row
    h = jnp.dot(x_ref[...], w1_ref[...], preferred_element_type=jnp.float32)
    h = jnp.maximum(h + b1_ref[...], 0.0)                       # bias + ReLU (VPU)
    # Layer 2: contract H between the (1, H) w2 row and the (TILE_B, H)
    # activations -> lane-dense (1, TILE_B) row, negligible MXU occupancy.
    logit = jnp.einsum("oh,bh->ob", w2_ref[...], h,
                       preferred_element_type=jnp.float32) + b2_ref[0, 0]
    o_ref[...] = jax.nn.sigmoid(logit).astype(o_ref.dtype)      # exp on the EUP


def prepare_params(w1, b1, w2, b2, compute_dtype=jnp.float32):
    """One-time conversion from torch nn.Linear layout to kernel layout.

    Call once (at init / checkpoint load) and reuse — keeps the per-forward
    path free of weight transposes / casts.
    """
    H, D = w1.shape
    w1_t = jnp.asarray(w1).T.astype(compute_dtype)        # (D, H)
    b1_r = jnp.asarray(b1, jnp.float32).reshape(1, H)     # (1, H)
    w2_r = jnp.asarray(w2, jnp.float32).reshape(1, H)     # (1, H)
    b2_r = jnp.asarray(b2, jnp.float32).reshape(1, 1)     # (1, 1) -> SMEM
    return w1_t, b1_r, w2_r, b2_r


@functools.partial(jax.jit, static_argnames=("tile_b",))
def regression2_forward(x, w1_t, b1_r, w2_r, b2_r, *, tile_b=512):
    """x: (B, ...) flattened to (B, size1). Returns (B, 1) float32."""
    B = x.shape[0]
    x2d = x.reshape(B, -1).astype(w1_t.dtype)   # stream x in the weights' dtype
    D = x2d.shape[1]
    H = w1_t.shape[1]

    # Batch tiling: pad B up to a tile multiple (tiles stay >= 16 rows).
    tile_b = min(tile_b, _round_up(B, 16))
    b_pad = _round_up(B, tile_b)
    if b_pad != B:
        x2d = jnp.pad(x2d, ((0, b_pad - B), (0, 0)))
    grid = (b_pad // tile_b,)

    itm = x2d.dtype.itemsize
    cost = pl.CostEstimate(
        flops=2 * b_pad * D * H + 2 * b_pad * H,
        transcendentals=b_pad,
        bytes_accessed=b_pad * D * itm + D * H * itm + 2 * H * 4 + b_pad * 4 + 4,
    )

    out_row = pl.pallas_call(
        regression2_kernel,
        out_shape=jax.ShapeDtypeStruct((1, b_pad), jnp.float32),
        grid=grid,
        in_specs=[
            pl.BlockSpec((tile_b, D), lambda i: (i, 0)),      # x: streamed tiles
            pl.BlockSpec((D, H), lambda i: (0, 0)),           # w1: VMEM-resident
            pl.BlockSpec((1, H), lambda i: (0, 0)),           # b1: VMEM-resident
            pl.BlockSpec((1, H), lambda i: (0, 0)),           # w2 row: resident
            pl.BlockSpec((1, 1), lambda i: (0, 0),
                         memory_space=pltpu.MemorySpace.SMEM),  # b2 scalar
        ],
        out_specs=pl.BlockSpec((1, tile_b), lambda i: (0, i)),  # lane-dense row
        compiler_params=pltpu.CompilerParams(
            dimension_semantics=("parallel",),     # megacore-shard batch tiles
            vmem_limit_bytes=48 * 1024 * 1024,     # fits v7x's 64 MiB VMEM
        ),
        cost_estimate=cost,
    )(x2d, w1_t, b1_r, w2_r, b2_r)

    return out_row[0, :B].reshape(B, 1)


def init_params(key, size1, size2=256):
    """Torch nn.Linear default init (uniform +-1/sqrt(fan_in)), torch layout."""
    k1, k2, k3, k4 = jax.random.split(key, 4)
    bound1 = 1.0 / jnp.sqrt(size1)
    bound2 = 1.0 / jnp.sqrt(size2)
    w1 = jax.random.uniform(k1, (size2, size1), jnp.float32, -bound1, bound1)
    b1 = jax.random.uniform(k2, (size2,), jnp.float32, -bound1, bound1)
    w2 = jax.random.uniform(k3, (1, size2), jnp.float32, -bound2, bound2)
    b2 = jax.random.uniform(k4, (1,), jnp.float32, -bound2, bound2)
    return w1, b1, w2, b2


if __name__ == "__main__":
    key = jax.random.PRNGKey(0)
    kx, kp = jax.random.split(key)

    # NCHW feature map flattened by the module: size1 = 4 * 16 * 16 = 1024.
    B, C, Hh, Ww = 2, 4, 16, 16
    size1 = C * Hh * Ww
    size2 = 256

    x = jax.random.normal(kx, (B, C, Hh, Ww), jnp.float32)
    w1, b1, w2, b2 = init_params(kp, size1, size2)

    # Pure-JAX reference (torch-layout weights).
    x2d = x.reshape(B, -1)
    ref = jax.nn.sigmoid(jnp.maximum(x2d @ w1.T + b1, 0.0) @ w2.T + b2)

    # f32 path.
    params_f32 = prepare_params(w1, b1, w2, b2)
    out = jax.block_until_ready(regression2_forward(x, *params_f32))
    assert out.shape == (B, 1)
    assert jnp.allclose(out, ref, atol=1e-3, rtol=1e-3)

    # bf16 streaming path (halves HBM traffic for x / w1; f32 accumulation).
    params_bf16 = prepare_params(w1, b1, w2, b2, compute_dtype=jnp.bfloat16)
    out_bf16 = jax.block_until_ready(regression2_forward(x, *params_bf16))
    assert out_bf16.shape == (B, 1)
    assert jnp.allclose(out_bf16, ref, atol=5e-2)

    print("KERNEL_OK")
</pallas_src>

<mosaic_0001>
module attributes {stable_mosaic.version = 11 : i64} {
  func.func @regression2_kernel(%arg0: i32, %arg1: memref<16x1024xf32, #tpu.memory_space<vmem>>, %arg2: memref<1024x256xf32, #tpu.memory_space<vmem>>, %arg3: memref<1x256xf32, #tpu.memory_space<vmem>>, %arg4: memref<1x256xf32, #tpu.memory_space<vmem>>, %arg5: memref<1x1xf32, #tpu.memory_space<smem>>, %arg6: memref<1x16xf32, #tpu.memory_space<vmem>>) attributes {dimension_semantics = [#tpu.dimension_semantics<parallel>], iteration_bounds = array<i64: 1>, scalar_prefetch = 0 : i64, scratch_operands = 0 : i64, tpu.core_type = #tpu.core_type<tc>, window_params = [{transform_indices = @transform_0, window_bounds = array<i64: 16, 1024>}, {pipeline_mode = #tpu.pipeline_mode<synchronous>, transform_indices = @transform_1, window_bounds = array<i64: 1024, 256>}, {pipeline_mode = #tpu.pipeline_mode<synchronous>, transform_indices = @transform_2, window_bounds = array<i64: 1, 256>}, {pipeline_mode = #tpu.pipeline_mode<synchronous>, transform_indices = @transform_3, window_bounds = array<i64: 1, 256>}, {transform_indices = @transform_4, window_bounds = array<i64: 1, 1>}, {transform_indices = @transform_5, window_bounds = array<i64: 1, 16>}]} {
    %c0 = arith.constant 0 : index
    %c0_0 = arith.constant 0 : index
    %0 = vector.load %arg1[%c0, %c0_0] : memref<16x1024xf32, #tpu.memory_space<vmem>>, vector<16x1024xf32>
    %c0_1 = arith.constant 0 : index
    %c0_2 = arith.constant 0 : index
    %1 = vector.load %arg2[%c0_1, %c0_2] : memref<1024x256xf32, #tpu.memory_space<vmem>>, vector<1024x256xf32>
    %cst = arith.constant dense<0.000000e+00> : vector<16x256xf32>
    %2 = tpu.matmul %0, %1, %cst {dimension_numbers = #tpu.dot_dimension_numbers<[1], [0], [0], [1], [0, 0, 1, 1], [], []>} : vector<16x1024xf32>, vector<1024x256xf32>, vector<16x256xf32> -> vector<16x256xf32>
    %c0_3 = arith.constant 0 : index
    %c0_4 = arith.constant 0 : index
    %3 = vector.load %arg3[%c0_3, %c0_4] : memref<1x256xf32, #tpu.memory_space<vmem>>, vector<1x256xf32>
    %4 = vector.broadcast %3 : vector<1x256xf32> to vector<16x256xf32>
    %5 = arith.addf %2, %4 : vector<16x256xf32>
    %cst_5 = arith.constant 0.000000e+00 : f32
    %6 = vector.broadcast %cst_5 : f32 to vector<16x256xf32>
    %7 = arith.maximumf %5, %6 : vector<16x256xf32>
    %c0_6 = arith.constant 0 : index
    %c0_7 = arith.constant 0 : index
    %8 = vector.load %arg4[%c0_6, %c0_7] : memref<1x256xf32, #tpu.memory_space<vmem>>, vector<1x256xf32>
    "tpu.trace_start"() <{level = 10 : i32, message = "oh,bh->ob"}> : () -> ()
    %cst_8 = arith.constant dense<0.000000e+00> : vector<1x16xf32>
    %9 = tpu.matmul %8, %7, %cst_8 {dimension_numbers = #tpu.dot_dimension_numbers<[1], [1], [0], [0], [0, 0, 1, 0], [], []>} : vector<1x256xf32>, vector<16x256xf32>, vector<1x16xf32> -> vector<1x16xf32>
    "tpu.trace_stop"() : () -> ()
    %c0_9 = arith.constant 0 : index
    %c0_10 = arith.constant 0 : index
    %10 = memref.load %arg5[%c0_9, %c0_10] : memref<1x1xf32, #tpu.memory_space<smem>>
    %11 = vector.broadcast %10 : f32 to vector<1x16xf32>
    %12 = arith.addf %9, %11 : vector<1x16xf32>
    %13 = arith.negf %12 : vector<1x16xf32>
    %14 = math.exp %13 : vector<1x16xf32>
    %cst_11 = arith.constant 1.000000e+00 : f32
    %15 = vector.broadcast %cst_11 : f32 to vector<1x16xf32>
    %16 = arith.addf %15, %14 : vector<1x16xf32>
    %17 = arith.divf %15, %16 : vector<1x16xf32>
    %c0_12 = arith.constant 0 : index
    %c0_13 = arith.constant 0 : index
    %18 = vector.load %arg6[%c0_12, %c0_13] : memref<1x16xf32, #tpu.memory_space<vmem>>, vector<1x16xf32>
    tpu.vector_store %arg6[%c0_12, %c0_13], %17 {strides = array<i32>} : memref<1x16xf32, #tpu.memory_space<vmem>>, vector<1x16xf32>,
    return
  }
  func.func @transform_0(%arg0: i32) -> (i32, i32) {
    %c0_i32 = arith.constant 0 : i32
    %c0_i32_0 = arith.constant 0 : i32
    return %arg0, %c0_i32 : i32, i32
  }
  func.func @transform_1(%arg0: i32) -> (i32, i32) {
    %c0_i32 = arith.constant 0 : i32
    %c0_i32_0 = arith.constant 0 : i32
    %c0_i32_1 = arith.constant 0 : i32
    return %c0_i32, %c0_i32_0 : i32, i32
  }
  func.func @transform_2(%arg0: i32) -> (i32, i32) {
    %c0_i32 = arith.constant 0 : i32
    %c0_i32_0 = arith.constant 0 : i32
    %c0_i32_1 = arith.constant 0 : i32
    return %c0_i32, %c0_i32_0 : i32, i32
  }
  func.func @transform_3(%arg0: i32) -> (i32, i32) {
    %c0_i32 = arith.constant 0 : i32
    %c0_i32_0 = arith.constant 0 : i32
    %c0_i32_1 = arith.constant 0 : i32
    return %c0_i32, %c0_i32_0 : i32, i32
  }
  func.func @transform_4(%arg0: i32) -> (i32, i32) {
    %c0_i32 = arith.constant 0 : i32
    %c0_i32_0 = arith.constant 0 : i32
    %c0_i32_1 = arith.constant 0 : i32
    return %c0_i32, %c0_i32_0 : i32, i32
  }
  func.func @transform_5(%arg0: i32) -> (i32, i32) {
    %c0_i32 = arith.constant 0 : i32
    %c0_i32_0 = arith.constant 0 : i32
    return %c0_i32, %arg0 : i32, i32
  }
}

</mosaic_0001>

<bundles_post_ra>
// kernel: regression2_forward.1
= control target key start
LH: loop header
LB: loop body
LE: loop exit
PB: predicated region body
PF: predicated region fallthrough
CT: control target
= control target key end

     0   :  { %11 = vsyncpa [#allocation4], 0  ;;  %s795_s21 = smov [#allocation3]   ;;  %s796_s23 = smov 256   ;;  %s955_s0 = inlined_call_operand.vmem [shape: f32[16,1024], index: 0, kind: input, shape index: {}]   ;;  %s956_s1 = inlined_call_operand.hbm [shape: f32[1024,256], index: 1, kind: input, shape index: {}]   ;;  %s957_s2 = inlined_call_operand.vmem [shape: f32[1,256], index: 2, kind: input, shape index: {}]   ;;  %s958_s3 = inlined_call_operand.vmem [shape: f32[1,256], index: 3, kind: input, shape index: {}]   ;;  %s959_s4 = inlined_call_operand.<no memory space> [shape: f32[1,1], index: 4, kind: input, shape index: {}]   ;;  %s960_s5 = inlined_call_operand.vmem [shape: f32[1,16], index: 5, kind: output, shape index: {}]  }
   0x1   :  { %s18_s20 = sshll.u32 %s956_s1, 4  ;;  %s20_s22 = sshll.u32 %s795_s21, 4  ;;  %s19_s20 = int_to_ptr.hbm [resolvable:$true] %s18_s20  ;;  %s21_s22 = int_to_ptr.vmem [resolvable:$true] %s20_s22 }
   0x2   :  { %s797_s24 = smov 16  }
   0x3   :  { %26 = dma.hbm_to_vmem [thread:$0]  %s19_s20, 32768, %s21_s22, [#allocation4], %s796_s23, %s796_s23, %s797_s24  }
   0x4   :  { %793 = dma.done.wait [#allocation4], 32768  }
   0x5   :  { %794 = vsyncadd [#allocation4], 4294934528  ;;  %v83_v0 = vld [vmem:[#allocation3 + $0xf0] sm:$0xff]  ;;  %v81_v2 = vld [vmem:[#allocation3 + $0xe0] sm:$0xff]  ;;  %vm754_vm3 = vcmask 122880  }
   0x6   :  { %v147_v1 = vld [vmem:[#allocation3 + $0x2f0] sm:$0xff]  ;;  %315 = vmatpush.msra.mxu0 %v83_v0  ;;  %v145_v4 = vld [vmem:[#allocation3 + $0x2e0] sm:$0xff] }
   0x7   :  { %361 = vmatpush.msra.mxu2 %v147_v1  ;;  %v115_v3 = vld [vmem:[#allocation3 + $0x1f0] sm:$0xff]  ;;  %v113_v7 = vld [vmem:[#allocation3 + $0x1e0] sm:$0xff] }
   0x8   :  { %v179_v5 = vld [vmem:[#allocation3 + $0x3f0] sm:$0xff]  ;;  %338 = vmatpush.msra.mxu1 %v115_v3  ;;  %316 = vmatpush.msra.mxu0 %v81_v2  ;;  %v177_v9 = vld [vmem:[#allocation3 + $0x3e0] sm:$0xff] }
   0x9   :  { %384 = vmatpush.msra.mxu3 %v179_v5  ;;  %v79_v6 = vld [vmem:[#allocation3 + $0xd0] sm:$0xff]  ;;  %362 = vmatpush.msra.mxu2 %v145_v4  ;;  %v77_v11 = vld [vmem:[#allocation3 + $0xc0] sm:$0xff] }
   0xa   :  { %v143_v8 = vld [vmem:[#allocation3 + $0x2d0] sm:$0xff]  ;;  %339 = vmatpush.msra.mxu1 %v113_v7  ;;  %v141_v12 = vld [vmem:[#allocation3 + $0x2c0] sm:$0xff]  ;;  %317 = vmatpush.msra.mxu0 %v79_v6 }
   0xb   :  { %v111_v10 = vld [vmem:[#allocation3 + $0x1d0] sm:$0xff]  ;;  %385 = vmatpush.msra.mxu3 %v177_v9  ;;  %363 = vmatpush.msra.mxu2 %v143_v8  ;;  %v109_v14 = vld [vmem:[#allocation3 + $0x1c0] sm:$0xff] }
   0xc   :  { %v175_v13 = vld [vmem:[#allocation3 + $0x3d0] sm:$0xff]  ;;  %v173_v15 = vld [vmem:[#allocation3 + $0x3c0] sm:$0xff]  ;;  %340 = vmatpush.msra.mxu1 %v111_v10  ;;  %318 = vmatpush.msra.mxu0 %v77_v11 }
   0xd   :  { %386 = vmatpush.msra.mxu3 %v175_v13  ;;  %v75_v16 = vld [vmem:[#allocation3 + $0xb0] sm:$0xff]  ;;  %364 = vmatpush.msra.mxu2 %v141_v12  ;;  %v73_v20 = vld [vmem:[#allocation3 + $0xa0] sm:$0xff] }
   0xe   :  { %v139_v17 = vld [vmem:[#allocation3 + $0x2b0] sm:$0xff]  ;;  %341 = vmatpush.msra.mxu1 %v109_v14  ;;  %v137_v21 = vld [vmem:[#allocation3 + $0x2a0] sm:$0xff]  ;;  %319 = vmatpush.msra.mxu0 %v75_v16 }
   0xf   :  { %v107_v18 = vld [vmem:[#allocation3 + $0x1b0] sm:$0xff]  ;;  %387 = vmatpush.msra.mxu3 %v173_v15  ;;  %365 = vmatpush.msra.mxu2 %v139_v17  ;;  %v105_v22 = vld [vmem:[#allocation3 + $0x1a0] sm:$0xff] }
  0x10   :  { %v171_v19 = vld [vmem:[#allocation3 + $0x3b0] sm:$0xff]  ;;  %v169_v23 = vld [vmem:[#allocation3 + $0x3a0] sm:$0xff]  ;;  %342 = vmatpush.msra.mxu1 %v107_v18  ;;  %320 = vmatpush.msra.mxu0 %v73_v20 }
  0x11   :  { %388 = vmatpush.msra.mxu3 %v171_v19  ;;  %v71_v24 = vld [vmem:[#allocation3 + $0x90] sm:$0xff]  ;;  %366 = vmatpush.msra.mxu2 %v137_v21  ;;  %v69_v28 = vld [vmem:[#allocation3 + $0x80] sm:$0xff] }
  0x12   :  { %v135_v25 = vld [vmem:[#allocation3 + $0x290] sm:$0xff]  ;;  %343 = vmatpush.msra.mxu1 %v105_v22  ;;  %v133_v29 = vld [vmem:[#allocation3 + $0x280] sm:$0xff]  ;;  %321 = vmatpush.msra.mxu0 %v71_v24 }
  0x13   :  { %v103_v26 = vld [vmem:[#allocation3 + $0x190] sm:$0xff]  ;;  %389 = vmatpush.msra.mxu3 %v169_v23  ;;  %367 = vmatpush.msra.mxu2 %v135_v25  ;;  %v101_v30 = vld [vmem:[#allocation3 + $0x180] sm:$0xff] }
  0x14   :  { %v167_v27 = vld [vmem:[#allocation3 + $0x390] sm:$0xff]  ;;  %v165_v31 = vld [vmem:[#allocation3 + $0x380] sm:$0xff]  ;;  %344 = vmatpush.msra.mxu1 %v103_v26  ;;  %322 = vmatpush.msra.mxu0 %v69_v28 }
  0x15   :  { %390 = vmatpush.msra.mxu3 %v167_v27  ;;  %v67_v32 = vld [vmem:[#allocation3 + $0x70] sm:$0xff]  ;;  %368 = vmatpush.msra.mxu2 %v133_v29  ;;  %v65_v36 = vld [vmem:[#allocation3 + $0x60] sm:$0xff] }
  0x16   :  { %v131_v33 = vld [vmem:[#allocation3 + $0x270] sm:$0xff]  ;;  %345 = vmatpush.msra.mxu1 %v101_v30  ;;  %v129_v37 = vld [vmem:[#allocation3 + $0x260] sm:$0xff]  ;;  %323 = vmatpush.msra.mxu0 %v67_v32 }
  0x17   :  { %v99_v34 = vld [vmem:[#allocation3 + $0x170] sm:$0xff]  ;;  %391 = vmatpush.msra.mxu3 %v165_v31  ;;  %369 = vmatpush.msra.mxu2 %v131_v33  ;;  %v97_v38 = vld [vmem:[#allocation3 + $0x160] sm:$0xff] }
  0x18   :  { %v163_v35 = vld [vmem:[#allocation3 + $0x370] sm:$0xff]  ;;  %v161_v39 = vld [vmem:[#allocation3 + $0x360] sm:$0xff]  ;;  %346 = vmatpush.msra.mxu1 %v99_v34  ;;  %324 = vmatpush.msra.mxu0 %v65_v36  ;;  %v845_v36 = vld [vmem:[%s955_s0 + $0x18] sm:$0xff] }
  0x19   :  { %392 = vmatpush.msra.mxu3 %v163_v35  ;;  %v63_v40 = vld [vmem:[#allocation3 + $0x50] sm:$0xff]  ;;  %370 = vmatpush.msra.mxu2 %v129_v37  ;;  %v61_v44 = vld [vmem:[#allocation3 + $0x40] sm:$0xff] }
  0x1a   :  { %v127_v41 = vld [vmem:[#allocation3 + $0x250] sm:$0xff]  ;;  %347 = vmatpush.msra.mxu1 %v97_v38  ;;  %v125_v45 = vld [vmem:[#allocation3 + $0x240] sm:$0xff]  ;;  %325 = vmatpush.msra.mxu0 %v63_v40 }
  0x1b   :  { %v95_v42 = vld [vmem:[#allocation3 + $0x150] sm:$0xff]  ;;  %393 = vmatpush.msra.mxu3 %v161_v39  ;;  %371 = vmatpush.msra.mxu2 %v127_v41  ;;  %v93_v46 = vld [vmem:[#allocation3 + $0x140] sm:$0xff]  ;;  %v851_v41 = vld [vmem:[%s955_s0 + $0x8] sm:$0xff] }
  0x1c   :  { %v159_v43 = vld [vmem:[#allocation3 + $0x350] sm:$0xff]  ;;  %v157_v47 = vld [vmem:[#allocation3 + $0x340] sm:$0xff]  ;;  %348 = vmatpush.msra.mxu1 %v95_v42  ;;  %326 = vmatpush.msra.mxu0 %v61_v44 }
  0x1d   :  { %394 = vmatpush.msra.mxu3 %v159_v43  ;;  %v59_v48 = vld [vmem:[#allocation3 + $0x30] sm:$0xff]  ;;  %372 = vmatpush.msra.mxu2 %v125_v45  ;;  %v57_v52 = vld [vmem:[#allocation3 + $0x20] sm:$0xff] }
  0x1e   :  { %v123_v49 = vld [vmem:[#allocation3 + $0x230] sm:$0xff]  ;;  %349 = vmatpush.msra.mxu1 %v93_v46  ;;  %v121_v53 = vld [vmem:[#allocation3 + $0x220] sm:$0xff]  ;;  %327 = vmatpush.msra.mxu0 %v59_v48 }
  0x1f   :  { %v91_v50 = vld [vmem:[#allocation3 + $0x130] sm:$0xff]  ;;  %395 = vmatpush.msra.mxu3 %v157_v47  ;;  %373 = vmatpush.msra.mxu2 %v123_v49  ;;  %v89_v54 = vld [vmem:[#allocation3 + $0x120] sm:$0xff] }
  0x20   :  { %v155_v51 = vld [vmem:[#allocation3 + $0x330] sm:$0xff]  ;;  %v153_v55 = vld [vmem:[#allocation3 + $0x320] sm:$0xff]  ;;  %350 = vmatpush.msra.mxu1 %v91_v50  ;;  %328 = vmatpush.msra.mxu0 %v57_v52 }
  0x21   :  { %396 = vmatpush.msra.mxu3 %v155_v51  ;;  %v55_v56 = vld [vmem:[#allocation3 + $0x10] sm:$0xff]  ;;  %374 = vmatpush.msra.mxu2 %v121_v53  ;;  %v53_v60 = vld [vmem:[#allocation3] sm:$0xff] }
  0x22   :  { %v119_v57 = vld [vmem:[#allocation3 + $0x210] sm:$0xff]  ;;  %351 = vmatpush.msra.mxu1 %v89_v54  ;;  %v117_v61 = vld [vmem:[#allocation3 + $0x200] sm:$0xff]  ;;  %329 = vmatpush.msra.mxu0 %v55_v56  ;;  %v869_v56 = vld [vmem:[%s955_s0 + $0x58] sm:$0xff] }
  0x23   :  { %v87_v58 = vld [vmem:[#allocation3 + $0x110] sm:$0xff]  ;;  %397 = vmatpush.msra.mxu3 %v153_v55  ;;  %375 = vmatpush.msra.mxu2 %v119_v57  ;;  %v85_v0 = vld [vmem:[#allocation3 + $0x100] sm:$0xff] }
  0x24   :  { %v151_v59 = vld [vmem:[#allocation3 + $0x310] sm:$0xff]  ;;  %352 = vmatpush.msra.mxu1 %v87_v58  ;;  %v149_v1 = vld [vmem:[#allocation3 + $0x300] sm:$0xff]  ;;  %330 = vmatpush.msra.mxu0 %v53_v60 }
  0x25   :  { %v211_v62 = vld [vmem:[#allocation3 + $0x4f0] sm:$0xff]  ;;  %398 = vmatpush.msra.mxu3 %v151_v59  ;;  %376 = vmatpush.msra.mxu2 %v117_v61  ;;  %v209_v2 = vld [vmem:[#allocation3 + $0x4e0] sm:$0xff]  ;;  %v875_v61 = vld [vmem:[%s955_s0 + $0x48] sm:$0xff] }
  0x26   :  { %v275_v63 = vld [vmem:[#allocation3 + $0x6f0] sm:$0xff]  ;;  %407 = vmatpush.msrb.mxu0 %v211_v62  ;;  %v273_v4 = vld [vmem:[#allocation3 + $0x6e0] sm:$0xff]  ;;  %353 = vmatpush.msra.mxu1 %v85_v0 }
  0x27   :  { %v243_v3 = vld [vmem:[#allocation3 + $0x5f0] sm:$0xff]  ;;  %453 = vmatpush.msrb.mxu2 %v275_v63  ;;  %399 = vmatpush.msra.mxu3 %v149_v1  ;;  %v241_v7 = vld [vmem:[#allocation3 + $0x5e0] sm:$0xff] }
  0x28   :  { %v307_v5 = vld [vmem:[#allocation3 + $0x7f0] sm:$0xff]  ;;  %408 = vmatpush.msrb.mxu0 %v209_v2  ;;  %430 = vmatpush.msrb.mxu1 %v243_v3  ;;  %v305_v9 = vld [vmem:[#allocation3 + $0x7e0] sm:$0xff] }
  0x29   :  { %v207_v6 = vld [vmem:[#allocation3 + $0x4d0] sm:$0xff]  ;;  %454 = vmatpush.msrb.mxu2 %v273_v4  ;;  %476 = vmatpush.msrb.mxu3 %v307_v5  ;;  %v205_v10 = vld [vmem:[#allocation3 + $0x4c0] sm:$0xff] }
  0x2a   :  { %v271_v8 = vld [vmem:[#allocation3 + $0x6d0] sm:$0xff]  ;;  %409 = vmatpush.msrb.mxu0 %v207_v6  ;;  %431 = vmatpush.msrb.mxu1 %v241_v7  ;;  %v269_v12 = vld [vmem:[#allocation3 + $0x6c0] sm:$0xff]  ;;  %v84_v7 = vld [vmem:[#allocation3 + $0xf8] sm:$0xff] }
  0x2b   :  { %v239_v11 = vld [vmem:[#allocation3 + $0x5d0] sm:$0xff]  ;;  %455 = vmatpush.msrb.mxu2 %v271_v8  ;;  %477 = vmatpush.msrb.mxu3 %v305_v9  ;;  %v237_v15 = vld [vmem:[#allocation3 + $0x5c0] sm:$0xff]  ;;  %v148_v8 = vld [vmem:[#allocation3 + $0x2f8] sm:$0xff] }
  0x2c   :  { %v303_v13 = vld [vmem:[#allocation3 + $0x7d0] sm:$0xff]  ;;  %410 = vmatpush.msrb.mxu0 %v205_v10  ;;  %432 = vmatpush.msrb.mxu1 %v239_v11  ;;  %v301_v17 = vld [vmem:[#allocation3 + $0x7c0] sm:$0xff] }
  0x2d   :  { %v203_v14 = vld [vmem:[#allocation3 + $0x4b0] sm:$0xff]  ;;  %456 = vmatpush.msrb.mxu2 %v269_v12  ;;  %478 = vmatpush.msrb.mxu3 %v303_v13  ;;  %v201_v18 = vld [vmem:[#allocation3 + $0x4a0] sm:$0xff]  ;;  %v893_v12 = vld [vmem:[%s955_s0 + $0x38] sm:$0xff] }
  0x2e   :  { %v267_v16 = vld [vmem:[#allocation3 + $0x6b0] sm:$0xff]  ;;  %411 = vmatpush.msrb.mxu0 %v203_v14  ;;  %433 = vmatpush.msrb.mxu1 %v237_v15  ;;  %v265_v20 = vld [vmem:[#allocation3 + $0x6a0] sm:$0xff]  ;;  %v82_v13 = vld [vmem:[#allocation3 + $0xe8] sm:$0xff] }
  0x2f   :  { %v235_v19 = vld [vmem:[#allocation3 + $0x5b0] sm:$0xff]  ;;  %457 = vmatpush.msrb.mxu2 %v267_v16  ;;  %479 = vmatpush.msrb.mxu3 %v301_v17  ;;  %v233_v23 = vld [vmem:[#allocation3 + $0x5a0] sm:$0xff]  ;;  %v116_v14 = vld [vmem:[#allocation3 + $0x1f8] sm:$0xff] }
  0x30   :  { %v299_v21 = vld [vmem:[#allocation3 + $0x7b0] sm:$0xff]  ;;  %412 = vmatpush.msrb.mxu0 %v201_v18  ;;  %434 = vmatpush.msrb.mxu1 %v235_v19  ;;  %v297_v25 = vld [vmem:[#allocation3 + $0x7a0] sm:$0xff]  ;;  %v146_v15 = vld [vmem:[#allocation3 + $0x2e8] sm:$0xff] }
  0x31   :  { %v199_v22 = vld [vmem:[#allocation3 + $0x490] sm:$0xff]  ;;  %458 = vmatpush.msrb.mxu2 %v265_v20  ;;  %480 = vmatpush.msrb.mxu3 %v299_v21  ;;  %v197_v26 = vld [vmem:[#allocation3 + $0x480] sm:$0xff]  ;;  %v180_v16 = vld [vmem:[#allocation3 + $0x3f8] sm:$0xff] }
  0x32   :  { %v263_v24 = vld [vmem:[#allocation3 + $0x690] sm:$0xff]  ;;  %413 = vmatpush.msrb.mxu0 %v199_v22  ;;  %435 = vmatpush.msrb.mxu1 %v233_v23  ;;  %v261_v28 = vld [vmem:[#allocation3 + $0x680] sm:$0xff]  ;;  %v899_v17 = vld [vmem:[%s955_s0 + $0x28] sm:$0xff] }
  0x33   :  { %v231_v27 = vld [vmem:[#allocation3 + $0x590] sm:$0xff]  ;;  %459 = vmatpush.msrb.mxu2 %v263_v24  ;;  %481 = vmatpush.msrb.mxu3 %v297_v25  ;;  %v229_v32 = vld [vmem:[#allocation3 + $0x580] sm:$0xff]  ;;  %v80_v18 = vld [vmem:[#allocation3 + $0xd8] sm:$0xff] }
  0x34   :  { %v295_v29 = vld [vmem:[#allocation3 + $0x790] sm:$0xff]  ;;  %414 = vmatpush.msrb.mxu0 %v197_v26  ;;  %436 = vmatpush.msrb.mxu1 %v231_v27  ;;  %v293_v34 = vld [vmem:[#allocation3 + $0x780] sm:$0xff]  ;;  %v114_v19 = vld [vmem:[#allocation3 + $0x1e8] sm:$0xff] }
  0x35   :  { %v834_v30 = vld [vmem:[%s955_s0 + $0x10] sm:$0xff]  ;;  %460 = vmatpush.msrb.mxu2 %v261_v28  ;;  %482 = vmatpush.msrb.mxu3 %v295_v29  ;;  %v839_v35 = vld [vmem:[%s955_s0] sm:$0xff]  ;;  %v144_v20 = vld [vmem:[#allocation3 + $0x2d8] sm:$0xff] }
  0x36   :  { %v195_v31 = vld [vmem:[#allocation3 + $0x470] sm:$0xff]  ;;  %377 = vmatmul.f32.vlgmr.msra.gmra.mxu2 %v834_v30  ;;  %v193_v37 = vld [vmem:[#allocation3 + $0x460] sm:$0xff]  ;;  %437 = vmatpush.msrb.mxu1 %v229_v32  ;;  %v178_v21 = vld [vmem:[#allocation3 + $0x3e8] sm:$0xff] }
  0x37   :  { %v259_v33 = vld [vmem:[#allocation3 + $0x670] sm:$0xff]  ;;  %415 = vmatpush.msrb.mxu0 %v195_v31  ;;  %v257_v39 = vld [vmem:[#allocation3 + $0x660] sm:$0xff]  ;;  %483 = vmatpush.msrb.mxu3 %v293_v34  ;;  %v78_v22 = vld [vmem:[#allocation3 + $0xc8] sm:$0xff] }
  0x38   :  { %461 = vmatpush.msrb.mxu2 %v259_v33  ;;  %v227_v38 = vld [vmem:[#allocation3 + $0x570] sm:$0xff]  ;;  %331 = vmatmul.f32.vlgmr.msra.gmra.mxu0 %v839_v35  ;;  %v225_v43 = vld [vmem:[#allocation3 + $0x560] sm:$0xff]  ;;  %v112_v23 = vld [vmem:[#allocation3 + $0x1d8] sm:$0xff] }
  0x39   :  { %v291_v40 = vld [vmem:[#allocation3 + $0x770] sm:$0xff]  ;;  %400 = vmatmul.f32.vlgmr.msra.gmra.mxu3 %v845_v36  ;;  %416 = vmatpush.msrb.mxu0 %v193_v37  ;;  %v289_v45 = vld [vmem:[#allocation3 + $0x760] sm:$0xff]  ;;  %v142_v24 = vld [vmem:[#allocation3 + $0x2c8] sm:$0xff] }
  0x3a   :  { %v191_v42 = vld [vmem:[#allocation3 + $0x450] sm:$0xff]  ;;  %438 = vmatpush.msrb.mxu1 %v227_v38  ;;  %462 = vmatpush.msrb.mxu2 %v257_v39  ;;  %v189_v46 = vld [vmem:[#allocation3 + $0x440] sm:$0xff]  ;;  %v176_v25 = vld [vmem:[#allocation3 + $0x3d8] sm:$0xff] }
  0x3b   :  { %v255_v44 = vld [vmem:[#allocation3 + $0x650] sm:$0xff]  ;;  %484 = vmatpush.msrb.mxu3 %v291_v40  ;;  %354 = vmatmul.f32.vlgmr.msra.gmra.mxu1 %v851_v41  ;;  %v253_v48 = vld [vmem:[#allocation3 + $0x640] sm:$0xff]  ;;  %v76_v27 = vld [vmem:[#allocation3 + $0xb8] sm:$0xff] }
  0x3c   :  { %v223_v47 = vld [vmem:[#allocation3 + $0x550] sm:$0xff]  ;;  %417 = vmatpush.msrb.mxu0 %v191_v42  ;;  %439 = vmatpush.msrb.mxu1 %v225_v43  ;;  %v221_v52 = vld [vmem:[#allocation3 + $0x540] sm:$0xff]  ;;  %v110_v28 = vld [vmem:[#allocation3 + $0x1c8] sm:$0xff] }
  0x3d   :  { %v287_v49 = vld [vmem:[#allocation3 + $0x750] sm:$0xff]  ;;  %463 = vmatpush.msrb.mxu2 %v255_v44  ;;  %485 = vmatpush.msrb.mxu3 %v289_v45  ;;  %v285_v54 = vld [vmem:[#allocation3 + $0x740] sm:$0xff]  ;;  %v140_v29 = vld [vmem:[#allocation3 + $0x2b8] sm:$0xff] }
  0x3e   :  { %v858_v50 = vld [vmem:[%s955_s0 + $0x50] sm:$0xff]  ;;  %418 = vmatpush.msrb.mxu0 %v189_v46  ;;  %440 = vmatpush.msrb.mxu1 %v223_v47  ;;  %v863_v55 = vld [vmem:[%s955_s0 + $0x40] sm:$0xff]  ;;  %v174_v31 = vld [vmem:[#allocation3 + $0x3c8] sm:$0xff] }
  0x3f   :  { %v187_v51 = vld [vmem:[#allocation3 + $0x430] sm:$0xff]  ;;  %464 = vmatpush.msrb.mxu2 %v253_v48  ;;  %486 = vmatpush.msrb.mxu3 %v287_v49  ;;  %v185_v57 = vld [vmem:[#allocation3 + $0x420] sm:$0xff]  ;;  %v917_v33 = vld [vmem:[%s955_s0 + $0x78] sm:$0xff] }
  0x40   :  { %v251_v53 = vld [vmem:[#allocation3 + $0x630] sm:$0xff]  ;;  %380 = vmatmul.f32.gmra.mxu2 %v858_v50  ;;  %419 = vmatpush.msrb.mxu0 %v187_v51  ;;  %v249_v59 = vld [vmem:[#allocation3 + $0x620] sm:$0xff]  ;;  %v74_v34 = vld [vmem:[#allocation3 + $0xa8] sm:$0xff] }
  0x41   :  { %441 = vmatpush.msrb.mxu1 %v221_v52  ;;  %465 = vmatpush.msrb.mxu2 %v251_v53  ;;  %v219_v58 = vld [vmem:[#allocation3 + $0x530] sm:$0xff]  ;;  %v217_v63 = vld [vmem:[#allocation3 + $0x520] sm:$0xff]  ;;  %v108_v37 = vld [vmem:[#allocation3 + $0x1b8] sm:$0xff] }
  0x42   :  { %487 = vmatpush.msrb.mxu3 %v285_v54  ;;  %334 = vmatmul.f32.gmra.mxu0 %v863_v55  ;;  %v283_v60 = vld [vmem:[#allocation3 + $0x730] sm:$0xff]  ;;  %v281_v1 = vld [vmem:[#allocation3 + $0x720] sm:$0xff]  ;;  %v138_v38 = vld [vmem:[#allocation3 + $0x2a8] sm:$0xff] }
  0x43   :  { %403 = vmatmul.f32.gmra.mxu3 %v869_v56  ;;  %420 = vmatpush.msrb.mxu0 %v185_v57  ;;  %v183_v62 = vld [vmem:[#allocation3 + $0x410] sm:$0xff]  ;;  %v181_v2 = vld [vmem:[#allocation3 + $0x400] sm:$0xff]  ;;  %v172_v39 = vld [vmem:[#allocation3 + $0x3b8] sm:$0xff] }
  0x44   :  { %442 = vmatpush.msrb.mxu1 %v219_v58  ;;  %466 = vmatpush.msrb.mxu2 %v249_v59  ;;  %v247_v0 = vld [vmem:[#allocation3 + $0x610] sm:$0xff]  ;;  %v245_v4 = vld [vmem:[#allocation3 + $0x600] sm:$0xff]  ;;  %v923_v40 = vld [vmem:[%s955_s0 + $0x68] sm:$0xff] }
  0x45   :  { %488 = vmatpush.msrb.mxu3 %v283_v60  ;;  %357 = vmatmul.f32.gmra.mxu1 %v875_v61  ;;  %v215_v3 = vld [vmem:[#allocation3 + $0x510] sm:$0xff]  ;;  %v213_v9 = vld [vmem:[#allocation3 + $0x500] sm:$0xff]  ;;  %v72_v42 = vld [vmem:[#allocation3 + $0x98] sm:$0xff] }
  0x46   :  { %421 = vmatpush.msrb.mxu0 %v183_v62  ;;  %443 = vmatpush.msrb.mxu1 %v217_v63  ;;  %v279_v5 = vld [vmem:[#allocation3 + $0x710] sm:$0xff]  ;;  %v277_v10 = vld [vmem:[#allocation3 + $0x700] sm:$0xff]  ;;  %v106_v43 = vld [vmem:[#allocation3 + $0x1a8] sm:$0xff] }
  0x47   :  { %467 = vmatpush.msrb.mxu2 %v247_v0  ;;  %489 = vmatpush.msrb.mxu3 %v281_v1  ;;  %v882_v6 = vld [vmem:[%s955_s0 + $0x30] sm:$0xff]  ;;  %v887_v11 = vld [vmem:[%s955_s0 + $0x20] sm:$0xff]  ;;  %v136_v44 = vld [vmem:[#allocation3 + $0x298] sm:$0xff] }
  0x48   :  { %422 = vmatpush.msrb.mxu0 %v181_v2  ;;  %444 = vmatpush.msrb.mxu1 %v215_v3  ;;  %v906_v26 = vld [vmem:[%s955_s0 + $0x70] sm:$0xff]  ;;  %v911_v32 = vld [vmem:[%s955_s0 + $0x60] sm:$0xff]  ;;  %v170_v45 = vld [vmem:[#allocation3 + $0x3a8] sm:$0xff] }
  0x49   :  { %468 = vmatpush.msrb.mxu2 %v245_v4  ;;  %490 = vmatpush.msrb.mxu3 %v279_v5  ;;  %v70_v46 = vld [vmem:[#allocation3 + $0x88] sm:$0xff]  ;;  %v104_v47 = vld [vmem:[#allocation3 + $0x198] sm:$0xff] }
  0x4a   :  { %469 = vmatmul.f32.vlgmr.msrb.gmra.mxu2 %v882_v6  ;;  %499 = vmatpush.msra.mxu0 %v84_v7  ;;  %v134_v48 = vld [vmem:[#allocation3 + $0x288] sm:$0xff]  ;;  %v168_v49 = vld [vmem:[#allocation3 + $0x398] sm:$0xff] }
  0x4b   :  { %545 = vmatpush.msra.mxu2 %v148_v8  ;;  %445 = vmatpush.msrb.mxu1 %v213_v9  ;;  %v68_v51 = vld [vmem:[#allocation3 + $0x78] sm:$0xff]  ;;  %v102_v52 = vld [vmem:[#allocation3 + $0x188] sm:$0xff] }
  0x4c   :  { %491 = vmatpush.msrb.mxu3 %v277_v10  ;;  %423 = vmatmul.f32.vlgmr.msrb.gmra.mxu0 %v887_v11  ;;  %v132_v53 = vld [vmem:[#allocation3 + $0x278] sm:$0xff]  ;;  %v166_v54 = vld [vmem:[#allocation3 + $0x388] sm:$0xff] }
  0x4d   :  { %492 = vmatmul.f32.vlgmr.msrb.gmra.mxu3 %v893_v12  ;;  %500 = vmatpush.msra.mxu0 %v82_v13  ;;  %v66_v57 = vld [vmem:[#allocation3 + $0x68] sm:$0xff]  ;;  %v100_v58 = vld [vmem:[#allocation3 + $0x178] sm:$0xff] }
  0x4e   :  { %522 = vmatpush.msra.mxu1 %v116_v14  ;;  %546 = vmatpush.msra.mxu2 %v146_v15  ;;  %v130_v59 = vld [vmem:[#allocation3 + $0x268] sm:$0xff]  ;;  %v164_v60 = vld [vmem:[#allocation3 + $0x378] sm:$0xff] }
  0x4f   :  { %568 = vmatpush.msra.mxu3 %v180_v16  ;;  %446 = vmatmul.f32.vlgmr.msrb.gmra.mxu1 %v899_v17  ;;  %v64_v62 = vld [vmem:[#allocation3 + $0x58] sm:$0xff]  ;;  %v98_v63 = vld [vmem:[#allocation3 + $0x168] sm:$0xff] }
  0x50   :  { %501 = vmatpush.msra.mxu0 %v80_v18  ;;  %523 = vmatpush.msra.mxu1 %v114_v19  ;;  %v128_v0 = vld [vmem:[#allocation3 + $0x258] sm:$0xff]  ;;  %v162_v1 = vld [vmem:[#allocation3 + $0x368] sm:$0xff] }
  0x51   :  { %547 = vmatpush.msra.mxu2 %v144_v20  ;;  %569 = vmatpush.msra.mxu3 %v178_v21  ;;  %v62_v2 = vld [vmem:[#allocation3 + $0x48] sm:$0xff]  ;;  %v96_v3 = vld [vmem:[#allocation3 + $0x158] sm:$0xff] }
  0x52   :  { %502 = vmatpush.msra.mxu0 %v78_v22  ;;  %524 = vmatpush.msra.mxu1 %v112_v23  ;;  %v126_v4 = vld [vmem:[#allocation3 + $0x248] sm:$0xff]  ;;  %v160_v5 = vld [vmem:[#allocation3 + $0x358] sm:$0xff] }
  0x53   :  { %548 = vmatpush.msra.mxu2 %v142_v24  ;;  %570 = vmatpush.msra.mxu3 %v176_v25  ;;  %v60_v7 = vld [vmem:[#allocation3 + $0x38] sm:$0xff]  ;;  %v94_v8 = vld [vmem:[#allocation3 + $0x148] sm:$0xff] }
  0x54   :  { %472 = vmatmul.f32.gmra.mxu2 %v906_v26  ;;  %503 = vmatpush.msra.mxu0 %v76_v27  ;;  %v124_v9 = vld [vmem:[#allocation3 + $0x238] sm:$0xff]  ;;  %v158_v10 = vld [vmem:[#allocation3 + $0x348] sm:$0xff] }
  0x55   :  { %525 = vmatpush.msra.mxu1 %v110_v28  ;;  %549 = vmatpush.msra.mxu2 %v140_v29  ;;  %v58_v13 = vld [vmem:[#allocation3 + $0x28] sm:$0xff]  ;;  %v92_v14 = vld [vmem:[#allocation3 + $0x138] sm:$0xff] }
  0x56   :  { %571 = vmatpush.msra.mxu3 %v174_v31  ;;  %426 = vmatmul.f32.gmra.mxu0 %v911_v32  ;;  %v122_v15 = vld [vmem:[#allocation3 + $0x228] sm:$0xff]  ;;  %v156_v16 = vld [vmem:[#allocation3 + $0x338] sm:$0xff] }
  0x57   :  { %495 = vmatmul.f32.gmra.mxu3 %v917_v33  ;;  %504 = vmatpush.msra.mxu0 %v74_v34  ;;  %v56_v18 = vld [vmem:[#allocation3 + $0x18] sm:$0xff]  ;;  %v90_v19 = vld [vmem:[#allocation3 + $0x128] sm:$0xff] }
  0x58   :  { %526 = vmatpush.msra.mxu1 %v108_v37  ;;  %550 = vmatpush.msra.mxu2 %v138_v38  ;;  %v120_v20 = vld [vmem:[#allocation3 + $0x218] sm:$0xff]  ;;  %v154_v21 = vld [vmem:[#allocation3 + $0x328] sm:$0xff] }
  0x59   :  { %572 = vmatpush.msra.mxu3 %v172_v39  ;;  %449 = vmatmul.f32.gmra.mxu1 %v923_v40  ;;  %v54_v22 = vld [vmem:[#allocation3 + $0x8] sm:$0xff]  ;;  %v88_v23 = vld [vmem:[#allocation3 + $0x118] sm:$0xff] }
  0x5a   :  { %505 = vmatpush.msra.mxu0 %v72_v42  ;;  %527 = vmatpush.msra.mxu1 %v106_v43  ;;  %v118_v24 = vld [vmem:[#allocation3 + $0x208] sm:$0xff]  ;;  %v152_v25 = vld [vmem:[#allocation3 + $0x318] sm:$0xff] }
  0x5b   :  { %551 = vmatpush.msra.mxu2 %v136_v44  ;;  %573 = vmatpush.msra.mxu3 %v170_v45  ;;  %v212_v27 = vld [vmem:[#allocation3 + $0x4f8] sm:$0xff]  ;;  %v86_v29 = vld [vmem:[#allocation3 + $0x108] sm:$0xff] }
  0x5c   :  { %506 = vmatpush.msra.mxu0 %v70_v46  ;;  %528 = vmatpush.msra.mxu1 %v104_v47  ;;  %v276_v28 = vld [vmem:[#allocation3 + $0x6f8] sm:$0xff]  ;;  %v150_v31 = vld [vmem:[#allocation3 + $0x308] sm:$0xff] }
  0x5d   :  { %552 = vmatpush.msra.mxu2 %v134_v48  ;;  %574 = vmatpush.msra.mxu3 %v168_v49  ;;  %v210_v34 = vld [vmem:[#allocation3 + $0x4e8] sm:$0xff]  ;;  %v244_v37 = vld [vmem:[#allocation3 + $0x5f8] sm:$0xff] }
  0x5e   :  { %507 = vmatpush.msra.mxu0 %v68_v51  ;;  %529 = vmatpush.msra.mxu1 %v102_v52  ;;  %v274_v38 = vld [vmem:[#allocation3 + $0x6e8] sm:$0xff]  ;;  %v308_v39 = vld [vmem:[#allocation3 + $0x7f8] sm:$0xff] }
  0x5f   :  { %553 = vmatpush.msra.mxu2 %v132_v53  ;;  %575 = vmatpush.msra.mxu3 %v166_v54  ;;  %v208_v42 = vld [vmem:[#allocation3 + $0x4d8] sm:$0xff]  ;;  %v242_v43 = vld [vmem:[#allocation3 + $0x5e8] sm:$0xff] }
  0x60   :  { %508 = vmatpush.msra.mxu0 %v66_v57  ;;  %530 = vmatpush.msra.mxu1 %v100_v58  ;;  %v272_v44 = vld [vmem:[#allocation3 + $0x6d8] sm:$0xff]  ;;  %v306_v45 = vld [vmem:[#allocation3 + $0x7e8] sm:$0xff] }
  0x61   :  { %554 = vmatpush.msra.mxu2 %v130_v59  ;;  %576 = vmatpush.msra.mxu3 %v164_v60  ;;  %v206_v46 = vld [vmem:[#allocation3 + $0x4c8] sm:$0xff]  ;;  %v240_v47 = vld [vmem:[#allocation3 + $0x5d8] sm:$0xff] }
  0x62   :  { %509 = vmatpush.msra.mxu0 %v64_v62  ;;  %531 = vmatpush.msra.mxu1 %v98_v63  ;;  %v270_v48 = vld [vmem:[#allocation3 + $0x6c8] sm:$0xff]  ;;  %v304_v49 = vld [vmem:[#allocation3 + $0x7d8] sm:$0xff] }
  0x63   :  { %555 = vmatpush.msra.mxu2 %v128_v0  ;;  %577 = vmatpush.msra.mxu3 %v162_v1  ;;  %v204_v51 = vld [vmem:[#allocation3 + $0x4b8] sm:$0xff]  ;;  %v238_v52 = vld [vmem:[#allocation3 + $0x5c8] sm:$0xff] }
  0x64   :  { %510 = vmatpush.msra.mxu0 %v62_v2  ;;  %532 = vmatpush.msra.mxu1 %v96_v3  ;;  %v268_v53 = vld [vmem:[#allocation3 + $0x6b8] sm:$0xff]  ;;  %v302_v54 = vld [vmem:[#allocation3 + $0x7c8] sm:$0xff] }
  0x65   :  { %556 = vmatpush.msra.mxu2 %v126_v4  ;;  %578 = vmatpush.msra.mxu3 %v160_v5  ;;  %v202_v57 = vld [vmem:[#allocation3 + $0x4a8] sm:$0xff]  ;;  %v236_v58 = vld [vmem:[#allocation3 + $0x5b8] sm:$0xff] }
  0x66   :  { %511 = vmatpush.msra.mxu0 %v60_v7  ;;  %533 = vmatpush.msra.mxu1 %v94_v8  ;;  %v266_v59 = vld [vmem:[#allocation3 + $0x6a8] sm:$0xff]  ;;  %v300_v60 = vld [vmem:[#allocation3 + $0x7b8] sm:$0xff] }
  0x67   :  { %557 = vmatpush.msra.mxu2 %v124_v9  ;;  %579 = vmatpush.msra.mxu3 %v158_v10  ;;  %v200_v62 = vld [vmem:[#allocation3 + $0x498] sm:$0xff]  ;;  %v234_v63 = vld [vmem:[#allocation3 + $0x5a8] sm:$0xff] }
  0x68   :  { %512 = vmatpush.msra.mxu0 %v58_v13  ;;  %534 = vmatpush.msra.mxu1 %v92_v14  ;;  %v264_v0 = vld [vmem:[#allocation3 + $0x698] sm:$0xff]  ;;  %v298_v1 = vld [vmem:[#allocation3 + $0x7a8] sm:$0xff] }
  0x69   :  { %558 = vmatpush.msra.mxu2 %v122_v15  ;;  %580 = vmatpush.msra.mxu3 %v156_v16  ;;  %v198_v2 = vld [vmem:[#allocation3 + $0x488] sm:$0xff]  ;;  %v232_v3 = vld [vmem:[#allocation3 + $0x598] sm:$0xff] }
  0x6a   :  { %513 = vmatpush.msra.mxu0 %v56_v18  ;;  %535 = vmatpush.msra.mxu1 %v90_v19  ;;  %v262_v4 = vld [vmem:[#allocation3 + $0x688] sm:$0xff]  ;;  %v296_v5 = vld [vmem:[#allocation3 + $0x798] sm:$0xff] }
  0x6b   :  { %559 = vmatpush.msra.mxu2 %v120_v20  ;;  %581 = vmatpush.msra.mxu3 %v154_v21  ;;  %v196_v7 = vld [vmem:[#allocation3 + $0x478] sm:$0xff]  ;;  %v230_v8 = vld [vmem:[#allocation3 + $0x588] sm:$0xff] }
  0x6c   :  { %514 = vmatpush.msra.mxu0 %v54_v22  ;;  %536 = vmatpush.msra.mxu1 %v88_v23  ;;  %v260_v9 = vld [vmem:[#allocation3 + $0x678] sm:$0xff]  ;;  %v294_v10 = vld [vmem:[#allocation3 + $0x788] sm:$0xff] }
  0x6d   :  { %560 = vmatpush.msra.mxu2 %v118_v24  ;;  %582 = vmatpush.msra.mxu3 %v152_v25  ;;  %v194_v13 = vld [vmem:[#allocation3 + $0x468] sm:$0xff]  ;;  %v228_v14 = vld [vmem:[#allocation3 + $0x578] sm:$0xff] }
  0x6e   :  { %591 = vmatpush.msrb.mxu0 %v212_v27  ;;  %537 = vmatpush.msra.mxu1 %v86_v29  ;;  %v258_v15 = vld [vmem:[#allocation3 + $0x668] sm:$0xff]  ;;  %v292_v16 = vld [vmem:[#allocation3 + $0x778] sm:$0xff] }
  0x6f   :  { %637 = vmatpush.msrb.mxu2 %v276_v28  ;;  %583 = vmatpush.msra.mxu3 %v150_v31  ;;  %v192_v18 = vld [vmem:[#allocation3 + $0x458] sm:$0xff]  ;;  %v226_v19 = vld [vmem:[#allocation3 + $0x568] sm:$0xff] }
  0x70   :  { %592 = vmatpush.msrb.mxu0 %v210_v34  ;;  %614 = vmatpush.msrb.mxu1 %v244_v37  ;;  %v256_v20 = vld [vmem:[#allocation3 + $0x658] sm:$0xff]  ;;  %v254_v22 = vld [vmem:[#allocation3 + $0x648] sm:$0xff] }
  0x71   :  { %638 = vmatpush.msrb.mxu2 %v274_v38  ;;  %660 = vmatpush.msrb.mxu3 %v308_v39  ;;  %v224_v21 = vld [vmem:[#allocation3 + $0x558] sm:$0xff]  ;;  %v286_v25 = vld [vmem:[#allocation3 + $0x748] sm:$0xff] }
  0x72   :  { %593 = vmatpush.msrb.mxu0 %v208_v42  ;;  %615 = vmatpush.msrb.mxu1 %v242_v43  ;;  %v288_v23 = vld [vmem:[#allocation3 + $0x758] sm:$0xff]  ;;  %v186_v27 = vld [vmem:[#allocation3 + $0x428] sm:$0xff] }
  0x73   :  { %639 = vmatpush.msrb.mxu2 %v272_v44  ;;  %661 = vmatpush.msrb.mxu3 %v306_v45  ;;  %v252_v24 = vld [vmem:[#allocation3 + $0x638] sm:$0xff]  ;;  %v250_v29 = vld [vmem:[#allocation3 + $0x628] sm:$0xff] }
  0x74   :  { %594 = vmatpush.msrb.mxu0 %v206_v46  ;;  %616 = vmatpush.msrb.mxu1 %v240_v47  ;;  %v220_v28 = vld [vmem:[#allocation3 + $0x538] sm:$0xff]  ;;  %v218_v37 = vld [vmem:[#allocation3 + $0x528] sm:$0xff] }
  0x75   :  { %640 = vmatpush.msrb.mxu2 %v270_v48  ;;  %662 = vmatpush.msrb.mxu3 %v304_v49  ;;  %v284_v31 = vld [vmem:[#allocation3 + $0x738] sm:$0xff]  ;;  %v246_v42 = vld [vmem:[#allocation3 + $0x608] sm:$0xff] }
  0x76   :  { %595 = vmatpush.msrb.mxu0 %v204_v51  ;;  %617 = vmatpush.msrb.mxu1 %v238_v52  ;;  %v184_v34 = vld [vmem:[#allocation3 + $0x418] sm:$0xff] }
  0x77   :  { %641 = vmatpush.msrb.mxu2 %v268_v53  ;;  %663 = vmatpush.msrb.mxu3 %v302_v54  ;;  %v248_v38 = vld [vmem:[#allocation3 + $0x618] sm:$0xff] }
  0x78   :  { %596 = vmatpush.msrb.mxu0 %v202_v57  ;;  %618 = vmatpush.msrb.mxu1 %v236_v58  ;;  %v216_v39 = vld [vmem:[#allocation3 + $0x518] sm:$0xff] }
  0x79   :  { %642 = vmatpush.msrb.mxu2 %v266_v59  ;;  %664 = vmatpush.msrb.mxu3 %v300_v60  ;;  %v280_v43 = vld [vmem:[#allocation3 + $0x718] sm:$0xff] }
  0x7a   :  { %597 = vmatpush.msrb.mxu0 %v200_v62  ;;  %619 = vmatpush.msrb.mxu1 %v234_v63 }
  0x7b   :  { %643 = vmatpush.msrb.mxu2 %v264_v0  ;;  %665 = vmatpush.msrb.mxu3 %v298_v1 }
  0x7c   :  { %598 = vmatpush.msrb.mxu0 %v198_v2  ;;  %620 = vmatpush.msrb.mxu1 %v232_v3 }
  0x7d   :  { %644 = vmatpush.msrb.mxu2 %v262_v4  ;;  %666 = vmatpush.msrb.mxu3 %v296_v5 }
  0x7e   :  { %515 = vmatmul.f32.vlgmr.msra.gmra.mxu0 %v839_v35  ;;  %561 = vmatmul.f32.vlgmr.msra.gmra.mxu2 %v834_v30  ;;  %v290_v35 = vld [vmem:[#allocation3 + $0x768] sm:$0xff] }
  0x7f   :  { %599 = vmatpush.msrb.mxu0 %v196_v7  ;;  %621 = vmatpush.msrb.mxu1 %v230_v8  ;;  %v190_v30 = vld [vmem:[#allocation3 + $0x448] sm:$0xff] }
  0x80   :  { %645 = vmatpush.msrb.mxu2 %v260_v9  ;;  %667 = vmatpush.msrb.mxu3 %v294_v10 }
  0x81   :  { %538 = vmatmul.f32.vlgmr.msra.gmra.mxu1 %v851_v41  ;;  %584 = vmatmul.f32.vlgmr.msra.gmra.mxu3 %v845_v36  ;;  %v188_v41 = vld [vmem:[#allocation3 + $0x438] sm:$0xff]  ;;  %v222_v36 = vld [vmem:[#allocation3 + $0x548] sm:$0xff] }
  0x82   :  { %600 = vmatpush.msrb.mxu0 %v194_v13  ;;  %622 = vmatpush.msrb.mxu1 %v228_v14 }
  0x83   :  { %646 = vmatpush.msrb.mxu2 %v258_v15  ;;  %668 = vmatpush.msrb.mxu3 %v292_v16 }
  0x84   :  { %601 = vmatpush.msrb.mxu0 %v192_v18  ;;  %623 = vmatpush.msrb.mxu1 %v226_v19 }
  0x85   :  { %647 = vmatpush.msrb.mxu2 %v256_v20  ;;  %669 = vmatpush.msrb.mxu3 %v290_v35 }
  0x86   :  { %602 = vmatpush.msrb.mxu0 %v190_v30  ;;  %624 = vmatpush.msrb.mxu1 %v224_v21  ;;  %v687_v30 = vld [vmem:[%s958_s3] sm:$0x3] }
  0x87   :  { %648 = vmatpush.msrb.mxu2 %v254_v22  ;;  %670 = vmatpush.msrb.mxu3 %v288_v23  ;;  %v691_v21 = vperm.slane %v687_v30, 0 }
  0x88   :  { %518 = vmatmul.f32.gmra.mxu0 %v863_v55  ;;  %564 = vmatmul.f32.gmra.mxu2 %v858_v50  ;;  %v282_v55 = vld [vmem:[#allocation3 + $0x728] sm:$0xff] }
  0x89   :  { %603 = vmatpush.msrb.mxu0 %v188_v41  ;;  %625 = vmatpush.msrb.mxu1 %v222_v36  ;;  %v182_v50 = vld [vmem:[#allocation3 + $0x408] sm:$0xff] }
  0x8a   :  { %649 = vmatpush.msrb.mxu2 %v252_v24  ;;  %671 = vmatpush.msrb.mxu3 %v286_v25 }
  0x8b   :  { %541 = vmatmul.f32.gmra.mxu1 %v875_v61  ;;  %587 = vmatmul.f32.gmra.mxu3 %v869_v56  ;;  %v214_v61 = vld [vmem:[#allocation3 + $0x508] sm:$0xff] }
  0x8c   :  { %604 = vmatpush.msrb.mxu0 %v186_v27  ;;  %626 = vmatpush.msrb.mxu1 %v220_v28  ;;  %v278_v56 = vld [vmem:[#allocation3 + $0x708] sm:$0xff] }
  0x8d   :  { %650 = vmatpush.msrb.mxu2 %v250_v29  ;;  %672 = vmatpush.msrb.mxu3 %v284_v31 }
  0x8e   :  { %605 = vmatpush.msrb.mxu0 %v184_v34  ;;  %627 = vmatpush.msrb.mxu1 %v218_v37 }
  0x8f   :  { %651 = vmatpush.msrb.mxu2 %v248_v38  ;;  %673 = vmatpush.msrb.mxu3 %v282_v55 }
  0x90   :  { %606 = vmatpush.msrb.mxu0 %v182_v50  ;;  %628 = vmatpush.msrb.mxu1 %v216_v39 }
  0x91   :  { %652 = vmatpush.msrb.mxu2 %v246_v42  ;;  %674 = vmatpush.msrb.mxu3 %v280_v43 }
  0x92   :  { %607 = vmatmul.f32.vlgmr.msrb.gmra.mxu0 %v887_v11  ;;  %653 = vmatmul.f32.vlgmr.msrb.gmra.mxu2 %v882_v6  ;;  %v309_v6 = vld [vmem:[%s957_s2] sm:$0x3] }
  0x93   :  { %629 = vmatpush.msrb.mxu1 %v214_v61  ;;  %675 = vmatpush.msrb.mxu3 %v278_v56  ;;  %v311_v47 = vperm.slane %v309_v6, 0  ;;  %v312_v35 = vperm.slane %v309_v6, 1 }
  0x94   :  { %630 = vmatmul.f32.vlgmr.msrb.gmra.mxu1 %v899_v17  ;;  %676 = vmatmul.f32.vlgmr.msrb.gmra.mxu3 %v893_v12 }
  0x9a   :  { %610 = vmatmul.f32.gmra.mxu0 %v911_v32  ;;  %656 = vmatmul.f32.gmra.mxu2 %v906_v26 }
  0x9c   :  { %633 = vmatmul.f32.gmra.mxu1 %v923_v40  ;;  %679 = vmatmul.f32.gmra.mxu3 %v917_v33 }
  0xb5   :  { %v332_v44 = vpop.f32.mrf.mxu0 }
  0xb6   :  { %v333_v48 = vadd.f32 %v332_v44, %v311_v47 }
  0xb8   :  { %v355_v45 = vpop.f32.mrf.mxu1 }
  0xb9   :  { %v378_v46 = vpop.f32.mrf.mxu2  ;;  %v356_v51 = vadd.f32 %v355_v45, %v333_v48 }
  0xbb   :  { %v379_v40 = vadd.f32 %v378_v46, %v356_v51 }
  0xbc   :  { %v401_v11 = vpop.f32.mrf.mxu3 }
  0xbd   :  { %v402_v57 = vadd.f32 %v401_v11, %v379_v40 }
  0xbf   :  { %v335_v17 = vpop.f32.mrf.mxu0 }
  0xc0   :  { %v336_v32 = vadd.f32 %v335_v17, %v311_v47 }
  0xc2   :  { %v358_v12 = vpop.f32.mrf.mxu1 }
  0xc3   :  { %v381_v49 = vpop.f32.mrf.mxu2  ;;  %v359_v52 = vadd.f32 %v358_v12, %v336_v32  ;;  %v689_v32 = vstv %s959_s4 }
  0xc5   :  { %v382_v33 = vadd.f32 %v381_v49, %v359_v52  ;;  %v692_v49 = vperm.slane %v687_v30, 1 }
  0xc6   :  { %v404_v26 = vpop.f32.mrf.mxu3 }
  0xc7   :  { %v405_v59 = vadd.f32 %v404_v26, %v382_v33 }
  0xc9   :  { %v424_v53 = vpop.f32.mrf.mxu0 }
  0xca   :  { %v425_v62 = vadd.f32 %v424_v53, %v402_v57 }
  0xcc   :  { %v447_v54 = vpop.f32.mrf.mxu1 }
  0xcd   :  { %v470_v58 = vpop.f32.mrf.mxu2  ;;  %v448_v1 = vadd.f32 %v447_v54, %v425_v62 }
  0xcf   :  { %v471_v5 = vadd.f32 %v470_v58, %v448_v1 }
  0xd0   :  { %v493_v60 = vpop.f32.mrf.mxu3 }
  0xd1   :  { %v494_v10 = vadd.f32 %v493_v60, %v471_v5 }
  0xd3   :  { %v427_v63 = vpop.f32.mrf.mxu0  ;;  %v683_v14 = vmax.f32 %v494_v10, 0.0 }
  0xd4   :  { %v428_v0 = vadd.f32 %v427_v63, %v405_v59 }
  0xd6   :  { %v450_v2 = vpop.f32.mrf.mxu1 }
  0xd7   :  { %v451_v3 = vadd.f32 %v450_v2, %v428_v0  ;;  %v473_v4 = vpop.f32.mrf.mxu2 }
  0xd9   :  { %v474_v7 = vadd.f32 %v473_v4, %v451_v3 }
  0xda   :  { %v496_v8 = vpop.f32.mrf.mxu3 }
  0xdb   :  { %v497_v9 = vadd.f32 %v496_v8, %v474_v7 }
  0xdd   :  { %v685_v13 = vmax.f32 %v497_v9, 0.0 }
  0xdf   :  { %709 = vmatpush.xpose.msra.mxu0 %v685_v13 }
  0xe3   :  { %710 = vmatpush.xpose.msra.mxu0 %v683_v14 }
  0xe6   :  { %711 = vmatmul.f32.vlgmr.msra.gmra.mxu0 %v691_v21 }
  0xfb   :  { %v516_v15 = vpop.f32.mrf.mxu0 }
  0xfc   :  { %v517_v23 = vadd.f32 %v516_v15, %v312_v35 }
  0xfe   :  { %v539_v16 = vpop.f32.mrf.mxu1 }
  0xff   :  { %v540_v24 = vadd.f32 %v539_v16, %v517_v23 }
 0x101   :  { %v562_v18 = vpop.f32.mrf.mxu2 }
 0x102   :  { %v563_v31 = vadd.f32 %v562_v18, %v540_v24 }
 0x104   :  { %v585_v19 = vpop.f32.mrf.mxu3 }
 0x105   :  { %v519_v20 = vpop.f32.mrf.mxu0  ;;  %v586_v38 = vadd.f32 %v585_v19, %v563_v31 }
 0x106   :  { %v520_v41 = vadd.f32 %v519_v20, %v312_v35 }
 0x108   :  { %v542_v22 = vpop.f32.mrf.mxu1 }
 0x109   :  { %v543_v25 = vadd.f32 %v542_v22, %v520_v41 }
 0x10b   :  { %v565_v36 = vpop.f32.mrf.mxu2 }
 0x10c   :  { %v566_v34 = vadd.f32 %v565_v36, %v543_v25 }
 0x10e   :  { %v588_v27 = vpop.f32.mrf.mxu3 }
 0x10f   :  { %v608_v28 = vpop.f32.mrf.mxu0  ;;  %v589_v55 = vadd.f32 %v588_v27, %v566_v34 }
 0x110   :  { %v609_v42 = vadd.f32 %v608_v28, %v586_v38 }
 0x111   :  { %v631_v29 = vpop.f32.mrf.mxu1 }
 0x112   :  { %v632_v56 = vadd.f32 %v631_v29, %v609_v42 }
 0x115   :  { %v654_v37 = vpop.f32.mrf.mxu2 }
 0x116   :  { %v655_v46 = vadd.f32 %v654_v37, %v632_v56 }
 0x117   :  { %v611_v50 = vpop.f32.mrf.mxu0  ;;  %v677_v39 = vpop.f32.mrf.mxu3 }
 0x118   :  { %v612_v43 = vadd.f32 %v611_v50, %v589_v55  ;;  %v678_v17 = vadd.f32 %v677_v39, %v655_v46 }
 0x119   :  { %v634_v61 = vpop.f32.mrf.mxu1 }
 0x11a   :  { %v635_v44 = vadd.f32 %v634_v61, %v612_v43  ;;  %v684_v12 = vmax.f32 %v678_v17, 0.0 }
 0x11d   :  { %v657_v45 = vpop.f32.mrf.mxu2 }
 0x11e   :  { %v658_v6 = vadd.f32 %v657_v45, %v635_v44 }
 0x11f   :  { %v680_v11 = vpop.f32.mrf.mxu3 }
 0x120   :  { %v681_v47 = vadd.f32 %v680_v11, %v658_v6 }
 0x122   :  { %v686_v48 = vmax.f32 %v681_v47, 0.0 }
 0x124   :  { %729 = vmatpush.xpose.msra.mxu1 %v686_v48 }
 0x128   :  { %730 = vmatpush.xpose.msra.mxu1 %v684_v12 }
 0x12b   :  { %731 = vmatmul.f32.vlgmr.msra.gmra.mxu1 %v692_v49 }
 0x163   :  { %v712_v51 = vpop.f32.mrf.mxu0 }
 0x164   :  { %v713_v26 = vadd.f32 %v712_v51, %v689_v32 }
 0x1a8   :  { %v732_v52 = vpop.f32.mrf.mxu1 }
 0x1a9   :  { %v733_v40 = vadd.f32 %v732_v52, %v713_v26 }
 0x1ab   :  { %v761_v53 = vmul.f32 -1.442695, %v733_v40 }
 0x1ad   :  { %765 = vpow2.f32 %v761_v53 }
 0x1b3   :  { %v766_v33 = vpop.eup %765 }
 0x1b4   :  { %v738_v54 = vadd.f32 1.0, %v766_v33 }
 0x1b6   :  { %767 = vrcp.f32 %v738_v54  ;;  %v750_v60 = vand.u32 2147483648, %v738_v54  ;;  %v748_v63 = vand.u32 2147483647, %v738_v54  ;;  %vm744_vm1 = vweird.f32 %v738_v54 }
 0x1b8   :  { %v751_v1 = vor.u32 1.1754944e-38, %v750_v60  ;;  %vm749_vm4 = vcmp.eq.f32.partialorder %v748_v63, 8.507059e+37 }
 0x1bc   :  { %v768_v57 = vpop.eup %767 }
 0x1bd   :  { %v740_v58 = vmul.f32 %v768_v57, %v738_v54  ;;  %vm745_vm0 = vweird.f32 %v768_v57 }
 0x1be   :  { %vm746_vm2 = vmor %vm744_vm1, %vm745_vm0 }
 0x1bf   :  { %v741_v59 = vsub.f32 1.0, %v740_v58 }
 0x1c1   :  { %v742_v62 = vmul.f32 %v768_v57, %v741_v59 }
 0x1c3   :  { %v743_v0 = vadd.f32 %v768_v57, %v742_v62 }
 0x1c5   :  { %v747_v2 = vsel %vm746_vm2, %v768_v57, %v743_v0 }
 0x1c6   :  { %v752_v3 = vsel %vm749_vm4, %v751_v1, %v747_v2 }
 0x1c7   :  { %755 = vst.msk [vmem:[%s960_s5] sm:$0x1] %vm754_vm3, %v752_v3 }
 0x1c8   :  { %760 = vsyncpa [#allocation4], 1 }

</bundles_post_ra>
